<compile_context>
chip_gen: v6e
topology: v6e:2x2x1
jax: 0.10.0
libtpu: 0.0.40
codegen_flags: <defaults>
</compile_context>

<pallas_src>
import functools

import jax
import jax.numpy as jnp
from jax.experimental import pallas as pl
from jax.experimental.pallas import tpu as pltpu

BN_EPS = 1e-5  # nn.BatchNorm1d default


def _round_up(x, m):
    return (x + m - 1) // m * m


def _vmem_caps():
    """(per-step tile budget, scoped vmem limit) in bytes, per TPU generation."""
    cap = 64 * 1024 * 1024  # conservative fallback = v7x physical VMEM
    try:
        cap = int(pltpu.get_tpu_info().vmem_capacity_bytes)
    except Exception:
        pass
    vmem_limit = min(cap * 3 // 4, 100 * 1024 * 1024)
    return vmem_limit // 2, vmem_limit


def _phase1_tile_l(c_in_pad, c_out_pad, k, l_out, budget):
    """Largest lane tile for the conv phase that fits the VMEM budget."""
    fixed = 2 * (k * c_out_pad * c_in_pad * 2)           # weight double-buffer (bf16)
    per_col = (2 * c_in_pad * 2                          # activation slab, bf16, 2 bufs
               + 2 * c_out_pad * 2                       # conv staging out, bf16, 2 bufs
               + c_out_pad * 4)                          # f32 accumulator
    avail = max(budget - fixed - (1 << 20), 128 * per_col)
    tl = max(128, min(avail // per_col, 8192) // 128 * 128)
    return int(min(tl, _round_up(l_out, 128)))


def _phase2_tile_l(c_out_pad, c_out, conv_l, budget):
    """Phase 2 only streams, so its tile is sized independently (and bigger)."""
    per_col = 2 * c_out_pad * 2 + 2 * c_out * 4
    tl = max(128, min(budget // per_col, 16384) // 128 * 128)
    return int(min(tl, conv_l))


def _conv_stats_kernel(x_ref, w_ref, conv_ref, stats_ref, *, l_out):
    """Phase 1: stride-1 Conv1d tile (K shifted bf16 MXU matmuls, f32 acc) plus
    per-tile partial sum / sum-of-squares for BatchNorm.

    x_ref:     (1, 1, C_in_pad, TL + K - 1) bf16  activation slab with halo
    w_ref:     (K, C_out_pad, C_in_pad)     bf16  tap-major weights
    conv_ref:  (1, C_out_pad, TL)           bf16  conv staging (NCL layout)
    stats_ref: (1, 1, C_out_pad, 2)         f32   per-tile [sum, sumsq]
    """
    k_size = w_ref.shape[0]
    tl = conv_ref.shape[2]
    x = x_ref[0, 0]                                     # (C_in_pad, TL + K - 1)

    acc = jnp.zeros((w_ref.shape[1], tl), jnp.float32)
    for k in range(k_size):                             # static unroll over taps
        acc = acc + jnp.dot(w_ref[k], x[:, k:k + tl],
                            preferred_element_type=jnp.float32)

    if l_out % tl != 0:
        # Zero the columns past the true L_out so they drop out of the BN sums.
        col = jax.lax.broadcasted_iota(jnp.int32, (1, tl), 1) + pl.program_id(1) * tl
        acc = jnp.where(col < l_out, acc, 0.0)

    # TODO(synk): dropout is None in the default config; training-mode dropout
    # (CDBR) would apply a pltpu.prng_random_bits mask to `acc` here.
    conv_ref[0] = acc.astype(conv_ref.dtype)
    stats_ref[0, 0, :, 0:1] = jnp.sum(acc, axis=1, keepdims=True)
    stats_ref[0, 0, :, 1:2] = jnp.sum(acc * acc, axis=1, keepdims=True)


def _bn_relu_kernel(conv_ref, scale_ref, shift_ref, out_ref):
    """Phase 2: y = relu(conv * scale + shift), written straight to NCL layout."""
    c_out = out_ref.shape[1]
    bl = out_ref.shape[2]
    y = conv_ref[0].astype(jnp.float32) * scale_ref[...] + shift_ref[...]
    out_ref[0] = jnp.maximum(y[:c_out, :bl], 0.0).astype(out_ref.dtype)


def conv_block_forward(x, weight, gamma, beta, *, stride=1, padding=1, pad_type="zero"):
    """x: (N, C_in, L) f32, weight: (C_out, C_in, K). Returns (N, C_out, L_out) f32."""
    if stride != 1:
        # TODO(synk): stride > 1 needs a strided-slab / im2col path; only the
        # module-default stride=1 is implemented as a fused Pallas kernel.
        raise NotImplementedError("Pallas ConvBlock kernel supports stride=1 only")

    N, C_in, L = x.shape
    C_out, _, K = weight.shape
    L_pad = L + 2 * padding
    L_out = L_pad - K + 1
    M = N * L_out

    C_in_pad = _round_up(C_in, 16)     # bf16 sublane quantum
    C_out_pad = _round_up(C_out, 16)

    tile_budget, vmem_limit = _vmem_caps()
    TL = _phase1_tile_l(C_in_pad, C_out_pad, K, L_out, tile_budget)
    num_l1 = pl.cdiv(L_out, TL)
    conv_L = num_l1 * TL
    halo = TL + K - 1
    L_need = conv_L + K - 1

    # ---- preprocessing: bf16 cast FIRST, then pad + per-tile halo windows ----
    x_b = x.astype(jnp.bfloat16)
    if pad_type == "zero":
        x_p = jnp.pad(x_b, ((0, 0), (0, 0), (padding, padding)))
    elif pad_type == "reflect":
        x_p = jnp.pad(x_b, ((0, 0), (0, 0), (padding, padding)), mode="reflect")
    else:
        raise ValueError(pad_type)
    x_p = jnp.pad(x_p, ((0, 0), (0, C_in_pad - C_in), (0, L_need - L_pad)))
    idx = (jnp.arange(num_l1, dtype=jnp.int32)[:, None] * TL
           + jnp.arange(halo, dtype=jnp.int32)[None, :])           # (num_l1, halo)
    x_halo = jnp.transpose(x_p[:, :, idx], (0, 2, 1, 3))            # (N, num_l1, C_in_pad, halo)

    w_stack = jnp.transpose(weight, (2, 0, 1))                      # (K, C_out, C_in)
    w_stack = jnp.pad(w_stack, ((0, 0), (0, C_out_pad - C_out),
                                (0, C_in_pad - C_in))).astype(jnp.bfloat16)

    # ---- Phase 1: fused conv + per-tile BN partial stats (fully parallel grid) ----
    conv_stage, stats_part = pl.pallas_call(
        functools.partial(_conv_stats_kernel, l_out=L_out),
        out_shape=(
            jax.ShapeDtypeStruct((N, C_out_pad, conv_L), jnp.bfloat16),
            jax.ShapeDtypeStruct((N, num_l1, C_out_pad, 2), jnp.float32),
        ),
        grid_spec=pltpu.PrefetchScalarGridSpec(
            num_scalar_prefetch=0,
            grid=(N, num_l1),
            in_specs=[
                pl.BlockSpec((1, 1, C_in_pad, halo), lambda n, j: (n, j, 0, 0)),
                pl.BlockSpec((K, C_out_pad, C_in_pad), lambda n, j: (0, 0, 0)),
            ],
            out_specs=(
                pl.BlockSpec((1, C_out_pad, TL), lambda n, j: (n, 0, j)),
                pl.BlockSpec((1, 1, C_out_pad, 2), lambda n, j: (n, j, 0, 0)),
            ),
        ),
        compiler_params=pltpu.CompilerParams(
            dimension_semantics=("parallel", "parallel"),
            vmem_limit_bytes=vmem_limit,
        ),
        cost_estimate=pl.CostEstimate(
            flops=2 * N * conv_L * C_in_pad * K * C_out_pad,
            transcendentals=0,
            bytes_accessed=int(x_halo.size * 2 + w_stack.size * 2
                               + N * C_out_pad * conv_L * 2
                               + N * num_l1 * C_out_pad * 2 * 4),
        ),
    )(x_halo, w_stack)

    # ---- tiny JAX reduction: global batch stats -> per-channel scale/shift ----
    stats = jnp.sum(stats_part, axis=(0, 1))                 # (C_out_pad, 2)
    inv_m = 1.0 / float(M)
    mean = stats[:, 0] * inv_m
    var = jnp.maximum(stats[:, 1] * inv_m - mean * mean, 0.0)  # clamp E[x^2]-E[x]^2 >= 0
    inv_std = jax.lax.rsqrt(var + BN_EPS)
    gamma_p = jnp.pad(gamma.astype(jnp.float32), (0, C_out_pad - C_out))
    beta_p = jnp.pad(beta.astype(jnp.float32), (0, C_out_pad - C_out))
    scale = (gamma_p * inv_std).reshape(C_out_pad, 1)
    shift = (beta_p - mean * gamma_p * inv_std).reshape(C_out_pad, 1)
    # TODO(synk): PyTorch training-mode BatchNorm1d also updates running_mean /
    # running_var (unbiased variance); this forward does not produce them.

    # ---- Phase 2: streaming BN affine + ReLU, written directly in NCL layout ----
    TL2 = _phase2_tile_l(C_out_pad, C_out, conv_L, tile_budget)
    num_l2 = pl.cdiv(L_out, TL2)
    out_block_l = TL2 if L_out >= TL2 else L_out

    out = pl.pallas_call(
        _bn_relu_kernel,
        out_shape=jax.ShapeDtypeStruct((N, C_out, L_out), jnp.float32),
        grid_spec=pltpu.PrefetchScalarGridSpec(
            num_scalar_prefetch=0,
            grid=(N, num_l2),
            in_specs=[
                pl.BlockSpec((1, C_out_pad, TL2), lambda n, j: (n, 0, j)),
                pl.BlockSpec((C_out_pad, 1), lambda n, j: (0, 0)),
                pl.BlockSpec((C_out_pad, 1), lambda n, j: (0, 0)),
            ],
            out_specs=pl.BlockSpec((1, C_out, out_block_l), lambda n, j: (n, 0, j)),
        ),
        compiler_params=pltpu.CompilerParams(
            dimension_semantics=("parallel", "parallel"),
            vmem_limit_bytes=vmem_limit,
        ),
        cost_estimate=pl.CostEstimate(
            flops=3 * N * C_out_pad * conv_L,
            transcendentals=0,
            bytes_accessed=int(N * C_out_pad * conv_L * 2 + N * C_out * L_out * 4),
        ),
    )(conv_stage, scale, shift)
    return out


def _reference(x, weight, gamma, beta, *, stride=1, padding=1, pad_type="zero",
               conv_dtype=jnp.float32):
    """Pure-JAX reference. conv_dtype=bfloat16 mirrors the kernel's MXU numerics."""
    if pad_type == "zero":
        x_pad = jnp.pad(x, ((0, 0), (0, 0), (padding, padding)))
    else:
        x_pad = jnp.pad(x, ((0, 0), (0, 0), (padding, padding)), mode="reflect")
    conv = jax.lax.conv_general_dilated(
        x_pad.astype(conv_dtype), weight.astype(conv_dtype),
        window_strides=(stride,), padding="VALID",
        dimension_numbers=("NCH", "OIH", "NCH"),
        preferred_element_type=jnp.float32)
    mean = jnp.mean(conv, axis=(0, 2), keepdims=True)
    var = jnp.mean((conv - mean) ** 2, axis=(0, 2), keepdims=True)
    y = (conv - mean) * jax.lax.rsqrt(var + BN_EPS)
    y = y * gamma[None, :, None] + beta[None, :, None]
    return jnp.maximum(y, 0.0)


if __name__ == "__main__":
    key = jax.random.PRNGKey(0)
    k_x, k_w, k_g, k_b = jax.random.split(key, 4)

    # Small shapes consistent with the module's forward (Conv1d -> NCL input).
    N, C_in, C_out, L, K = 2, 4, 8, 16, 3
    stride, padding = 1, 1

    x = jax.random.normal(k_x, (N, C_in, L), dtype=jnp.float32)
    weight = jax.random.normal(k_w, (C_out, C_in, K), dtype=jnp.float32) * 0.1
    gamma = 1.0 + 0.1 * jax.random.normal(k_g, (C_out,), dtype=jnp.float32)
    beta = 0.1 * jax.random.normal(k_b, (C_out,), dtype=jnp.float32)

    fwd = jax.jit(functools.partial(conv_block_forward, stride=stride,
                                    padding=padding, pad_type="zero"))
    out = jax.block_until_ready(fwd(x, weight, gamma, beta))
    assert out.shape == (N, C_out, L), out.shape

    # Check vs a reference using the same bf16-operand / f32-accumulate conv numerics.
    ref_bf16 = _reference(x, weight, gamma, beta, stride=stride, padding=padding,
                          conv_dtype=jnp.bfloat16)
    assert jnp.max(jnp.abs(out - ref_bf16)) < 2e-2, "mismatch vs bf16-matched reference"

    # Loose check vs the full-f32 reference (PyTorch semantics); slack covers bf16 rounding.
    ref_f32 = _reference(x, weight, gamma, beta, stride=stride, padding=padding,
                         conv_dtype=jnp.float32)
    assert jnp.max(jnp.abs(out - ref_f32)) < 5e-2, "mismatch vs f32 reference"

    print("KERNEL_OK")
</pallas_src>

<mosaic_0001>
module attributes {stable_mosaic.version = 11 : i64} {
  func.func @_conv_stats_kernel(%arg0: i32, %arg1: i32, %arg2: memref<1x1x16x130xbf16, #tpu.memory_space<vmem>>, %arg3: memref<3x16x16xbf16, #tpu.memory_space<vmem>>, %arg4: memref<1x16x128xbf16, #tpu.memory_space<vmem>>, %arg5: memref<1x1x16x2xf32, #tpu.memory_space<vmem>>) attributes {dimension_semantics = [#tpu.dimension_semantics<parallel>, #tpu.dimension_semantics<parallel>], iteration_bounds = array<i64: 2, 1>, scalar_prefetch = 0 : i64, scratch_operands = 0 : i64, tpu.core_type = #tpu.core_type<tc>, window_params = [{transform_indices = @transform_0, window_bounds = array<i64: 1, 1, 16, 130>}, {pipeline_mode = #tpu.pipeline_mode<synchronous>, transform_indices = @transform_1, window_bounds = array<i64: 3, 16, 16>}, {transform_indices = @transform_2, window_bounds = array<i64: 1, 16, 128>}, {transform_indices = @transform_3, window_bounds = array<i64: 1, 1, 16, 2>}]} {
    %c0 = arith.constant 0 : index
    %c0_0 = arith.constant 0 : index
    %c0_1 = arith.constant 0 : index
    %c0_2 = arith.constant 0 : index
    %0 = vector.load %arg2[%c0, %c0_0, %c0_1, %c0_2] : memref<1x1x16x130xbf16, #tpu.memory_space<vmem>>, vector<1x1x16x130xbf16>
    %1 = vector.shape_cast %0 : vector<1x1x16x130xbf16> to vector<16x130xbf16>
    %cst = arith.constant 0.000000e+00 : f32
    %2 = vector.broadcast %cst : f32 to vector<16x128xf32>
    %c0_3 = arith.constant 0 : index
    %c0_4 = arith.constant 0 : index
    %c0_5 = arith.constant 0 : index
    %3 = vector.load %arg3[%c0_3, %c0_4, %c0_5] : memref<3x16x16xbf16, #tpu.memory_space<vmem>>, vector<1x16x16xbf16>
    %4 = vector.shape_cast %3 : vector<1x16x16xbf16> to vector<16x16xbf16>
    %5 = vector.extract_strided_slice %1 {offsets = [0, 0], sizes = [16, 128], strides = [1, 1]} : vector<16x130xbf16> to vector<16x128xbf16>
    %cst_6 = arith.constant dense<0.000000e+00> : vector<16x128xf32>
    %6 = tpu.matmul %4, %5, %cst_6 {dimension_numbers = #tpu.dot_dimension_numbers<[1], [0], [0], [1], [0, 0, 1, 1], [], []>} : vector<16x16xbf16>, vector<16x128xbf16>, vector<16x128xf32> -> vector<16x128xf32>
    %7 = arith.addf %2, %6 : vector<16x128xf32>
    %c1 = arith.constant 1 : index
    %c0_7 = arith.constant 0 : index
    %c0_8 = arith.constant 0 : index
    %8 = vector.load %arg3[%c1, %c0_7, %c0_8] : memref<3x16x16xbf16, #tpu.memory_space<vmem>>, vector<1x16x16xbf16>
    %9 = vector.shape_cast %8 : vector<1x16x16xbf16> to vector<16x16xbf16>
    %10 = vector.extract_strided_slice %1 {offsets = [0, 1], sizes = [16, 128], strides = [1, 1]} : vector<16x130xbf16> to vector<16x128xbf16>
    %cst_9 = arith.constant dense<0.000000e+00> : vector<16x128xf32>
    %11 = tpu.matmul %9, %10, %cst_9 {dimension_numbers = #tpu.dot_dimension_numbers<[1], [0], [0], [1], [0, 0, 1, 1], [], []>} : vector<16x16xbf16>, vector<16x128xbf16>, vector<16x128xf32> -> vector<16x128xf32>
    %12 = arith.addf %7, %11 : vector<16x128xf32>
    %c2 = arith.constant 2 : index
    %c0_10 = arith.constant 0 : index
    %c0_11 = arith.constant 0 : index
    %13 = vector.load %arg3[%c2, %c0_10, %c0_11] : memref<3x16x16xbf16, #tpu.memory_space<vmem>>, vector<1x16x16xbf16>
    %14 = vector.shape_cast %13 : vector<1x16x16xbf16> to vector<16x16xbf16>
    %15 = vector.extract_strided_slice %1 {offsets = [0, 2], sizes = [16, 128], strides = [1, 1]} : vector<16x130xbf16> to vector<16x128xbf16>
    %cst_12 = arith.constant dense<0.000000e+00> : vector<16x128xf32>
    %16 = tpu.matmul %14, %15, %cst_12 {dimension_numbers = #tpu.dot_dimension_numbers<[1], [0], [0], [1], [0, 0, 1, 1], [], []>} : vector<16x16xbf16>, vector<16x128xbf16>, vector<16x128xf32> -> vector<16x128xf32>
    %17 = arith.addf %12, %16 : vector<16x128xf32>
    %18 = tpu.iota {dimensions = array<i32: 1>} : vector<1x128xi32>
    %c128_i32 = arith.constant 128 : i32
    %19 = arith.muli %arg1, %c128_i32 : i32
    %20 = vector.broadcast %19 : i32 to vector<1x128xi32>
    %21 = arith.addi %18, %20 : vector<1x128xi32>
    %c16_i32 = arith.constant 16 : i32
    %22 = vector.broadcast %c16_i32 : i32 to vector<1x128xi32>
    %23 = arith.cmpi slt, %21, %22 : vector<1x128xi32>
    %cst_13 = arith.constant 0.000000e+00 : f32
    %24 = vector.shape_cast %23 : vector<1x128xi1> to vector<1x128xi1>
    %25 = vector.broadcast %24 : vector<1x128xi1> to vector<16x128xi1>
    %26 = vector.broadcast %cst_13 : f32 to vector<16x128xf32>
    %27 = arith.select %25, %17, %26 : vector<16x128xi1>, vector<16x128xf32>
    %28 = arith.truncf %27 : vector<16x128xf32> to vector<16x128xbf16>
    %c0_14 = arith.constant 0 : index
    %c0_15 = arith.constant 0 : index
    %c0_16 = arith.constant 0 : index
    %29 = vector.load %arg4[%c0_14, %c0_15, %c0_16] : memref<1x16x128xbf16, #tpu.memory_space<vmem>>, vector<1x16x128xbf16>
    %30 = vector.shape_cast %29 : vector<1x16x128xbf16> to vector<16x128xbf16>
    %31 = vector.shape_cast %28 : vector<16x128xbf16> to vector<1x16x128xbf16>
    tpu.vector_store %arg4[%c0_14, %c0_15, %c0_16], %31 {strides = array<i32>} : memref<1x16x128xbf16, #tpu.memory_space<vmem>>, vector<1x16x128xbf16>,
    %cst_17 = arith.constant dense<0.000000e+00> : vector<16xf32>
    %32 = vector.multi_reduction <add>, %27, %cst_17 [1] : vector<16x128xf32> to vector<16xf32>
    %33 = vector.shape_cast %32 : vector<16xf32> to vector<16x1xf32>
    %c0_18 = arith.constant 0 : index
    %c0_19 = arith.constant 0 : index
    %c0_20 = arith.constant 0 : index
    %c0_21 = arith.constant 0 : index
    %34 = vector.load %arg5[%c0_18, %c0_19, %c0_20, %c0_21] : memref<1x1x16x2xf32, #tpu.memory_space<vmem>>, vector<1x1x16x1xf32>
    %35 = vector.shape_cast %34 : vector<1x1x16x1xf32> to vector<16x1xf32>
    %36 = vector.shape_cast %33 : vector<16x1xf32> to vector<1x1x16x1xf32>
    tpu.vector_store %arg5[%c0_18, %c0_19, %c0_20, %c0_21], %36 {strides = array<i32>} : memref<1x1x16x2xf32, #tpu.memory_space<vmem>>, vector<1x1x16x1xf32>,
    %37 = arith.mulf %27, %27 : vector<16x128xf32>
    %cst_22 = arith.constant dense<0.000000e+00> : vector<16xf32>
    %38 = vector.multi_reduction <add>, %37, %cst_22 [1] : vector<16x128xf32> to vector<16xf32>
    %39 = vector.shape_cast %38 : vector<16xf32> to vector<16x1xf32>
    %c0_23 = arith.constant 0 : index
    %c0_24 = arith.constant 0 : index
    %c0_25 = arith.constant 0 : index
    %c1_26 = arith.constant 1 : index
    %40 = vector.load %arg5[%c0_23, %c0_24, %c0_25, %c1_26] : memref<1x1x16x2xf32, #tpu.memory_space<vmem>>, vector<1x1x16x1xf32>
    %41 = vector.shape_cast %40 : vector<1x1x16x1xf32> to vector<16x1xf32>
    %42 = vector.shape_cast %39 : vector<16x1xf32> to vector<1x1x16x1xf32>
    tpu.vector_store %arg5[%c0_23, %c0_24, %c0_25, %c1_26], %42 {strides = array<i32>} : memref<1x1x16x2xf32, #tpu.memory_space<vmem>>, vector<1x1x16x1xf32>,
    return
  }
  func.func @transform_0(%arg0: i32, %arg1: i32) -> (i32, i32, i32, i32) {
    %c0_i32 = arith.constant 0 : i32
    %c0_i32_0 = arith.constant 0 : i32
    %c0_i32_1 = arith.constant 0 : i32
    return %arg0, %arg1, %c0_i32, %c0_i32_0 : i32, i32, i32, i32
  }
  func.func @transform_1(%arg0: i32, %arg1: i32) -> (i32, i32, i32) {
    %c0_i32 = arith.constant 0 : i32
    %c0_i32_0 = arith.constant 0 : i32
    %c0_i32_1 = arith.constant 0 : i32
    %c0_i32_2 = arith.constant 0 : i32
    return %c0_i32, %c0_i32_0, %c0_i32_1 : i32, i32, i32
  }
  func.func @transform_2(%arg0: i32, %arg1: i32) -> (i32, i32, i32) {
    %c0_i32 = arith.constant 0 : i32
    %c0_i32_0 = arith.constant 0 : i32
    return %arg0, %c0_i32, %arg1 : i32, i32, i32
  }
  func.func @transform_3(%arg0: i32, %arg1: i32) -> (i32, i32, i32, i32) {
    %c0_i32 = arith.constant 0 : i32
    %c0_i32_0 = arith.constant 0 : i32
    %c0_i32_1 = arith.constant 0 : i32
    return %arg0, %arg1, %c0_i32, %c0_i32_0 : i32, i32, i32, i32
  }
}

module attributes {stable_mosaic.version = 11 : i64} {
  func.func @_bn_relu_kernel(%arg0: i32, %arg1: i32, %arg2: memref<1x16x128xbf16, #tpu.memory_space<vmem>>, %arg3: memref<16x1xf32, #tpu.memory_space<vmem>>, %arg4: memref<16x1xf32, #tpu.memory_space<vmem>>, %arg5: memref<1x8x16xf32, #tpu.memory_space<vmem>>) attributes {dimension_semantics = [#tpu.dimension_semantics<parallel>, #tpu.dimension_semantics<parallel>], iteration_bounds = array<i64: 2, 1>, scalar_prefetch = 0 : i64, scratch_operands = 0 : i64, tpu.core_type = #tpu.core_type<tc>, window_params = [{transform_indices = @transform_0, window_bounds = array<i64: 1, 16, 128>}, {pipeline_mode = #tpu.pipeline_mode<synchronous>, transform_indices = @transform_1, window_bounds = array<i64: 16, 1>}, {pipeline_mode = #tpu.pipeline_mode<synchronous>, transform_indices = @transform_2, window_bounds = array<i64: 16, 1>}, {transform_indices = @transform_3, window_bounds = array<i64: 1, 8, 16>}]} {
    %c0 = arith.constant 0 : index
    %c0_0 = arith.constant 0 : index
    %c0_1 = arith.constant 0 : index
    %0 = vector.load %arg2[%c0, %c0_0, %c0_1] : memref<1x16x128xbf16, #tpu.memory_space<vmem>>, vector<1x16x128xbf16>
    %1 = vector.shape_cast %0 : vector<1x16x128xbf16> to vector<16x128xbf16>
    %2 = arith.extf %1 : vector<16x128xbf16> to vector<16x128xf32>
    %c0_2 = arith.constant 0 : index
    %c0_3 = arith.constant 0 : index
    %3 = vector.load %arg3[%c0_2, %c0_3] : memref<16x1xf32, #tpu.memory_space<vmem>>, vector<16x1xf32>
    %4 = vector.broadcast %3 : vector<16x1xf32> to vector<16x128xf32>
    %5 = arith.mulf %2, %4 : vector<16x128xf32>
    %c0_4 = arith.constant 0 : index
    %c0_5 = arith.constant 0 : index
    %6 = vector.load %arg4[%c0_4, %c0_5] : memref<16x1xf32, #tpu.memory_space<vmem>>, vector<16x1xf32>
    %7 = vector.broadcast %6 : vector<16x1xf32> to vector<16x128xf32>
    %8 = arith.addf %5, %7 : vector<16x128xf32>
    %9 = vector.extract_strided_slice %8 {offsets = [0, 0], sizes = [8, 16], strides = [1, 1]} : vector<16x128xf32> to vector<8x16xf32>
    %cst = arith.constant 0.000000e+00 : f32
    %10 = vector.broadcast %cst : f32 to vector<8x16xf32>
    %11 = arith.maximumf %9, %10 : vector<8x16xf32>
    %c0_6 = arith.constant 0 : index
    %c0_7 = arith.constant 0 : index
    %c0_8 = arith.constant 0 : index
    %12 = vector.load %arg5[%c0_6, %c0_7, %c0_8] : memref<1x8x16xf32, #tpu.memory_space<vmem>>, vector<1x8x16xf32>
    %13 = vector.shape_cast %12 : vector<1x8x16xf32> to vector<8x16xf32>
    %14 = vector.shape_cast %11 : vector<8x16xf32> to vector<1x8x16xf32>
    tpu.vector_store %arg5[%c0_6, %c0_7, %c0_8], %14 {strides = array<i32>} : memref<1x8x16xf32, #tpu.memory_space<vmem>>, vector<1x8x16xf32>,
    return
  }
  func.func @transform_0(%arg0: i32, %arg1: i32) -> (i32, i32, i32) {
    %c0_i32 = arith.constant 0 : i32
    %c0_i32_0 = arith.constant 0 : i32
    return %arg0, %c0_i32, %arg1 : i32, i32, i32
  }
  func.func @transform_1(%arg0: i32, %arg1: i32) -> (i32, i32) {
    %c0_i32 = arith.constant 0 : i32
    %c0_i32_0 = arith.constant 0 : i32
    %c0_i32_1 = arith.constant 0 : i32
    return %c0_i32, %c0_i32_0 : i32, i32
  }
  func.func @transform_2(%arg0: i32, %arg1: i32) -> (i32, i32) {
    %c0_i32 = arith.constant 0 : i32
    %c0_i32_0 = arith.constant 0 : i32
    %c0_i32_1 = arith.constant 0 : i32
    return %c0_i32, %c0_i32_0 : i32, i32
  }
  func.func @transform_3(%arg0: i32, %arg1: i32) -> (i32, i32, i32) {
    %c0_i32 = arith.constant 0 : i32
    %c0_i32_0 = arith.constant 0 : i32
    return %arg0, %c0_i32, %arg1 : i32, i32, i32
  }
}

</mosaic_0001>

<bundles_post_ra>
// kernel: conv_block_forward.3
= control target key start
LH: loop header
LB: loop body
LE: loop exit
PB: predicated region body
PF: predicated region fallthrough
CT: control target
= control target key end

     0   :  { %8 = vsyncpa [#allocation3], 0  ;;  %s577_s0 = inlined_call_operand.vmem [shape: bf16[2,16,128], index: 0, kind: input, shape index: {}]   ;;  %s578_s1 = inlined_call_operand.vmem [shape: f32[16,1], index: 1, kind: input, shape index: {}]   ;;  %s579_s2 = inlined_call_operand.vmem [shape: f32[16,1], index: 2, kind: input, shape index: {}]   ;;  %s580_s3 = inlined_call_operand.hbm [shape: f32[2,8,16], index: 3, kind: output, shape index: {}]  }
   0x1   :  { %10 = vsyncpa [#allocation3 + $0x1], 0  ;;  %s472_s12 = smov 0   ;;  %s474_s13 = smov 0  }
   0x2   :  { %s476_s14 = smov 0   ;;  %s478_s15 = smov 0  }
   0x3   :  { %s480_s16 = smov 0   ;;  %s482_s17 = smov 0  }
   0x4 LB: > { %s302_s18 = sadd.s32 4294967295, %s448_s17   ;;  %s303_s19 = sadd.s32 4294967294, %s448_s17   ;;  %s448_s17 = sphi %s482_s17, %s16_s17   ;;  %s444_s16 = sphi %s480_s16, %s587_s16   ;;  %s440_s15 = sphi %s478_s15, %s586_s15   ;;  %s436_s14 = sphi %s476_s14, %s585_s14   ;;  %s432_s13 = sphi %s474_s13, %s584_s13   ;;  %s428_s12 = sphi %s472_s12, %s583_s12  }
   0x5   : > { %s28_s20 = sadd.s32 1, %s444_s16  ;;  %s107_s21 = sadd.s32 1, %s436_s14 }
   0x6   : > { %p30_p0 = scmp.ge.s32.totalorder %s28_s20, 2  ;;  %p117_p1 = scmp.ne.s32.totalorder %s436_s14, %s432_s13 }
   0x7   : > { %p118_p2 = scmp.eq.s32.totalorder %s302_s18, 1  ;;  %p123_p3 = scmp.ne.s32.totalorder %s432_s13, %s428_s12 }
   0x8   : > { %s589_s20 = smov (%p30_p0, %s28_s20), 0  ;;  %p124_p5 = scmp.eq.s32.totalorder %s303_s19, 1 }
   0x9   : > { %p512_p4 = por %p118_p2, %p117_p1  ;;  %s102_s23 = ssub.s32 %s444_s16, %s589_s20 }
   0xa   : > { %p306_p6 = scmp.ge.s32.totalorder %s448_s17, 1  ;;  %p105_p7 = scmp.eq.s32.totalorder %s102_s23, 0 }
   0xb   : > { %p519_p8 = por %p124_p5, %p123_p3  ;;  %p159_p9 = scmp.lt.s32.totalorder %s448_s17, 3 }
   0xc   : > { %s525_s25 = scalar_select %p105_p7, %s436_s14, %s107_s21  }
   0xd   : > { %p160_p10 = pnand %p306_p6, %p159_p9 }
   0xe   : > { %p186_p11 = scmp.lt.s32.totalorder (!%p160_p10), %s440_s15, 1  ;;  %s183_s8 = sand.u32 (!%p160_p10), 1, %s432_s13  }
   0xf   : > { %163 = sbr.rel (%p160_p10) target bundleno = 167 (0xa7), region = 32  ;;  %s307_s9 = sshll.u32 (!%p160_p10), %s183_s8, 3 }
  0x10   : > { %s311_s10 = sshll.u32 (!%p160_p10), %s440_s15, 7  ;;  %s185_s11 = scalar_lea.vmem (!%p160_p10), [#allocation2], %s307_s9 }
  0x11   : > { %s228_s18 = sshll.u32 (!%p160_p10), %s185_s11, 4  ;;  %s226_s23 = scalar_lea.hbm (!%p160_p10), %s580_s3, %s311_s10  ;;  %s229_s18 = int_to_ptr.vmem [resolvable:$true] %s228_s18 }
  0x12   : > { %s214_s26 = scalar_lea.sflag (!%p160_p10), [#allocation3], %s183_s8  ;;  %s372_s27 = scalar_lea.vmem (!%p160_p10), %s229_s18, 128 }
  0x13   : > { %p373_p12 = scmp.ne.s32.totalorder (!%p160_p10), %s229_s18, %s372_s27  ;;  %s451_s28 = smov (!%p160_p10), [#allocation2]  }
  0x14   : > { %v196_v0 = vld [vmem:[%s578_s1] sm:$0xff]  ;;  %v450_v1 = vmov 0   ;;  %s187_s30 = scalar_select %p186_p11, %s440_s15, 1  ;;  %vm211_vm0 = vcmask 130048  }
  0x15   : > { %371 = vset.pattern.permute.xlu0 %v450_v1  ;;  %v203_v2 = vld [vmem:[%s579_s2] sm:$0xff]  ;;  %p374_p13 = pnand %p373_p12, %p512_p4  ;;  %s376_s29 = sshll.u32 %s451_s28, 4  ;;  %s377_s29 = int_to_ptr.vmem [resolvable:$false] %s376_s29 }
  0x16   : > { %199 = vperm.xlu0 %371, %v196_v0   ;;  %s314_s4 = sshll.u32 %s187_s30, 3  ;;  %s378_s15 = scalar_lea.vmem %s377_s29, 256 }
  0x17   : > { %s193_s7 = scalar_lea.vmem %s577_s0, %s314_s4  ;;  %p375_p0 = pneg %p374_p13 }
  0x18   : > { %v194_v3 = vld [vmem:[%s193_s7] sm:$0xf]  ;;  %p379_p1 = scmp.lt.s32.totalorder %s229_s18, %s377_s29  ;;  %p380_p2 = scmp.lt.s32.totalorder %s378_s15, %s372_s27 }
  0x19   : > { %v195_v4 = vunpack.c.l.bf16 %v194_v3 }
  0x1a   : > { %206 = vperm.xlu0 %371, %v203_v2   ;;  %p381_p3 = por %p380_p2, %p379_p1 }
  0x1c   : > { %p382_p5 = pnand %p381_p3, %p375_p0 }
  0x91   : > { %v200_v5 = vpop.permute.xlu0 %199 }
  0x92   : > { %v202_v6 = vmul.f32 %v200_v5, %v195_v4 }
  0x95   : > { %v207_v7 = vpop.permute.xlu0 %206 }
  0x96   : > { %v209_v8 = vadd.f32 %v207_v7, %v202_v6 }
  0x98   : > { %v210_v9 = vmax.f32 %v209_v8, 0.0 }
  0x9a   : > { %212 = vst.msk [vmem:[%s185_s11] sm:$0xff] %vm211_vm0, %v210_v9 }
  0x9b   : > { %385 = shalt.err (!%p382_p5)
}
  0x9c   : > { %s386_s30 = scalar_lea.hbm %s226_s23, 128  ;;  %s390_s6 = scalar_lea.hbm %s580_s3, 256 }
  0x9d   : > { %p387_p6 = scmp.ne.s32.totalorder %s226_s23, %s386_s30  ;;  %p391_p10 = scmp.lt.s32.totalorder %s226_s23, %s580_s3 }
  0x9e   : > { %p392_p11 = scmp.lt.s32.totalorder %s390_s6, %s386_s30 }
  0x9f   : > { %p388_p7 = pnand %p387_p6, %p512_p4 }
  0xa0   : > { %p393_p12 = por %p392_p11, %p391_p10 }
  0xa1   : > { %p389_p9 = pneg %p388_p7 }
  0xa3   : > { %p394_p13 = pnand %p393_p12, %p389_p9 }
  0xa5   : > { %397 = shalt.err (!%p394_p13)
}
  0xa6   : > { %315 = dma.vmem_to_hbm [thread:$0]  (%p512_p4), %s229_s18, 128, %s226_s23, %s214_s26  }
  0xa7 PF: > { %p321_p0 = scmp.ge.s32.totalorder %s448_s17, 2  ;;  %s240_s9 = sand.u32 1, %s428_s12  }
  0xa8   : > { %s241_s10 = scalar_lea.sflag [#allocation3], %s240_s9 }
  0xa9   : > { %p318_p1 = pnand %p321_p0, %p519_p8 }
  0xab   : > { %p319_p2 = pneg %p318_p1 }
  0xad   : > { %423 = dma.done.wait (%p319_p2), %s241_s10, 128  }
  0xae   : > { %425 = vsyncadd (%p319_p2), %s241_s10, 4294967168  ;;  %s16_s17 = sadd.s32 1, %s448_s17   ;;  %s583_s12 = smov %s432_s13 }
  0xaf   : > { %p13_p3 = scmp.ge.s32.totalorder %s16_s17, 4   ;;  %s584_s13 = smov %s436_s14 }
  0xb0   : > { %s585_s14 = smov %s525_s25  ;;  %s586_s15 = smov %s444_s16 }
  0xb1   : > { %s587_s16 = smov %s589_s20  ;;  %15 = sbr.rel (!%p13_p3) target bundleno = 4 (0x4), region = 67 }
  0xb6   :  { %246 = vsyncpa [#allocation3], 1 }
  0xb7   :  { %248 = vsyncpa [#allocation3 + $0x1], 1 }

// kernel: conv_block_forward.2
= control target key start
LH: loop header
LB: loop body
LE: loop exit
PB: predicated region body
PF: predicated region fallthrough
CT: control target
= control target key end

     0   :  { %s730_s12 = smov 0   ;;  %s732_s13 = smov 0   ;;  %s789_s0 = inlined_call_operand.vmem [shape: bf16[2,1,16,130], index: 0, kind: input, shape index: {}]   ;;  %s790_s1 = inlined_call_operand.vmem [shape: bf16[3,16,16], index: 1, kind: input, shape index: {}]   ;;  %s791_s2 = inlined_call_operand.vmem [shape: bf16[2,16,128], index: 2, kind: output, shape index: {0}]   ;;  %s792_s3 = inlined_call_operand.vmem [shape: f32[2,1,16,2], index: 3, kind: output, shape index: {1}]  }
   0x1   :  { %s734_s14 = smov 0  }
   0x2 LB: > { %s26_s15 = sadd.s32 1, %s700_s13  ;;  %p591_p0 = scmp.ge.s32.totalorder %s704_s14, 1  ;;  %s704_s14 = sphi %s734_s14, %s14_s14   ;;  %s700_s13 = sphi %s732_s13, %s794_s13   ;;  %s696_s12 = sphi %s730_s12, %s793_s12  }
   0x3   : > { %p28_p1 = scmp.ge.s32.totalorder %s26_s15, 2  ;;  %p162_p2 = scmp.lt.s32.totalorder %s704_s14, 3 }
   0x5   : > { %s796_s15 = smov (%p28_p1, %s26_s15), 0  ;;  %p163_p3 = pnand %p591_p0, %p162_p2 }
   0x6   : > { %p202_p4 = scmp.lt.s32.totalorder (!%p163_p3), %s696_s12, 1  ;;  %s708_s20 = smov (!%p163_p3), 126  }
   0x7   : > { %166 = sbr.rel (%p163_p3) target bundleno = 490 (0x1ea), region = 28  ;;  %s709_s21 = smov (!%p163_p3), 127  }
   0xc   : > { %v706_v0 = vmov 0.0   ;;  %s798_s12 = smov (!%p202_p4, %s696_s12), 1  ;;  %vm707_vm0 = vmmov 0   ;;  %v680_v3 = vld [vmem:[%s790_s1] sm:$0xff]   ;;  %vm256_vm1 = vcmask 130048   ;;  %vm253_vm2 = vcmask 1039360  }
   0xd   : > { %630 = vmatprep.subr.bf16.mxu0 %v706_v0  ;;  %636 = vmatprep.subr.bf16.mxu1 %v706_v0  ;;  %s614_s16 = sshll.u32 %s798_s12, 4  ;;  %vm363_vm3 = vcmask 1031168   ;;  %v679_v9 = vld [vmem:[%s790_s1 + $0x8] sm:$0xff]   ;;  %v681_v11 = vld [vmem:[%s790_s1 + $0x10] sm:$0xff]   ;;  %v412_v17 = vlaneseq  ;;  %s615_s28 = sshll.u32 %s798_s12, 3  ;;  %vm436_vm5 = vcmask 7168  }
   0xe   : > { %632 = vmatprep.mubr.msk.bf16.mxu0 %vm707_vm0, %v706_v0  ;;  %638 = vmatprep.mubr.msk.bf16.mxu1 %vm707_vm0, %v706_v0  ;;  %s210_s19 = scalar_lea.vmem %s789_s0, %s614_s16  ;;  %s218_s4 = scalar_lea.vmem %s791_s2, %s615_s28  ;;  %vm445_vm6 = vcmask 15368  }
   0xf   : > { %v676_v1 = vld [vmem:[%s210_s19] ss:$8 sps:$4 sm:$0xff]   ;;  %v678_v2 = vld [vmem:[%s210_s19 + $0x4] ss:$8 sps:$4 sm:$0xff]   ;;  %v413_v20 = vand.u32 127, %v412_v17  ;;  %s227_s7 = scalar_lea.vmem %s792_s3, %s614_s16 }
  0x10   : > { %359 = vrot.lane.b32.xlu1 %v676_v1, %s708_s20  ;;  %249 = vrot.lane.b32.xlu0 %v676_v1, %s709_s21 }
  0x11   : > { %637 = vmatpush3.bf16.msra.mxu1 %v676_v1  ;;  %vm417_vm4 = vcmp.lt.s32.totalorder %v413_v20, 16 }
  0x14   : > { %361 = vrot.lane.b32.xlu1 %v678_v2, %s708_s20  ;;  %251 = vrot.lane.b32.xlu0 %v678_v2, %s709_s21 }
  0x15   : > { %639 = vmatmul.mubr.msk.bf16.vlgmr.msra.gmra.mxu1 %vm256_vm1, %v680_v3 }
  0x82   : > { %v360_v4 = vpop.permute.xlu1 %359  ;;  %v250_v5 = vpop.permute.xlu0 %249 }
  0x86   : > { %v362_v6 = vpop.permute.xlu1 %361  ;;  %v252_v7 = vpop.permute.xlu0 %251 }
  0x87   : > { %v254_v8 = vsel %vm253_vm2, %v250_v5, %v252_v7  ;;  %v364_v10 = vsel %vm363_vm3, %v360_v4, %v362_v6 }
  0x88   : > { %631 = vmatpush3.bf16.msra.mxu0 %v254_v8 }
  0x89   : > { %642 = vmatprep.subr.bf16.mxu0 %v706_v0 }
  0x8b   : > { %633 = vmatmul.mubr.msk.bf16.vlgmr.msra.gmra.mxu0 %vm256_vm1, %v679_v9 }
  0x8c   : > { %643 = vmatpush3.bf16.msra.mxu0 %v364_v10  ;;  %644 = vmatprep.mubr.msk.bf16.mxu0 %vm707_vm0, %v706_v0 }
  0x93   : > { %645 = vmatmul.mubr.msk.bf16.vlgmr.msra.gmra.mxu0 %vm256_vm1, %v681_v11 }
  0xd5   : > { %v344_v12 = vpop.f32.mrf.mxu1 }
  0xd7   : > { %v640_v13 = vpop.f32.mrf.mxu1 }
  0xd9   : > { %v347_v14 = vpop.f32.mrf.mxu1 }
  0xdb   : > { %v641_v15 = vpop.f32.mrf.mxu1 }
 0x14b   : > { %v294_v16 = vpop.f32.mrf.mxu0 }
 0x14c   : > { %v345_v22 = vadd.f32 %v344_v12, %v294_v16 }
 0x14d   : > { %v634_v18 = vpop.f32.mrf.mxu0 }
 0x14f   : > { %v297_v19 = vpop.f32.mrf.mxu0 }
 0x150   : > { %v348_v26 = vadd.f32 %v347_v14, %v297_v19 }
 0x151   : > { %v635_v21 = vpop.f32.mrf.mxu0 }
 0x153   : > { %v403_v23 = vpop.f32.mrf.mxu0 }
 0x154   : > { %v410_v24 = vadd.f32 %v403_v23, %v345_v22 }
 0x155   : > { %v646_v25 = vpop.f32.mrf.mxu0 }
 0x156   : > { %v420_v27 = vsel %vm417_vm4, %v410_v24, 0.0 }
 0x157   : > { %v406_v28 = vpop.f32.mrf.mxu0  ;;  %432 = vadd.xlane.f32.xlu0 %v420_v27  ;;  %v439_v31 = vmul.f32 %v420_v27, %v420_v27 }
 0x158   : > { %v411_v29 = vadd.f32 %v406_v28, %v348_v26 }
 0x159   : > { %v647_v30 = vpop.f32.mrf.mxu0 }
 0x15a   : > { %v421_v32 = vsel %vm417_vm4, %v411_v29, 0.0 }
 0x15b   : > { %441 = vadd.xlane.f32.xlu0 %v439_v31  ;;  %434 = vadd.xlane.f32.xlu1 %v421_v32  ;;  %v622_v33 = vpack.c.bf16 %v421_v32, %v420_v27  ;;  %v440_v34 = vmul.f32 %v421_v32, %v421_v32 }
 0x15d   : > { %623 = vst [vmem:[%s218_s4] sm:$0xff] %v622_v33  }
 0x15f   : > { %443 = vadd.xlane.f32.xlu0 %v440_v34 }
 0x1e0   : > { %v433_v35 = vpop.xlane.xlu0 %432 }
 0x1e1   : > { %437 = vst.msk [vmem:[%s227_s7] sm:$0xff] %vm436_vm5, %v433_v35 }
 0x1e4   : > { %v442_v36 = vpop.xlane.xlu0 %441  ;;  %v435_v37 = vpop.xlane.xlu1 %434 }
 0x1e5   : > { %446 = vst.msk [vmem:[%s227_s7] sm:$0xff] %vm445_vm6, %v442_v36 }
 0x1e6   : > { %438 = vst.msk [vmem:[%s227_s7 + $0x8] sm:$0xff] %vm436_vm5, %v435_v37 }
 0x1e8   : > { %v444_v38 = vpop.xlane.xlu0 %443 }
 0x1e9   : > { %447 = vst.msk [vmem:[%s227_s7 + $0x8] sm:$0xff] %vm445_vm6, %v444_v38 }
 0x1ea PF: > { %s14_s14 = sadd.s32 1, %s704_s14   ;;  %s793_s12 = smov %s700_s13 }
 0x1eb   : > { %p11_p5 = scmp.ge.s32.totalorder %s14_s14, 4   ;;  %s794_s13 = smov %s796_s15 }
 0x1ed   :  { %13 = sbr.rel (!%p11_p5) target bundleno = 2 (0x2), region = 72 }

</bundles_post_ra>
